<compile_context>
chip_gen: v7x
topology: tpu7x:2x2x1
jax: 0.10.0
libtpu: 0.0.40
codegen_flags: <defaults>
</compile_context>

<pallas_src>
import jax
import jax.numpy as jnp
from jax.experimental import pallas as pl
from jax.experimental.pallas import tpu as pltpu


# ----------------------------- config (small, synthetic) -----------------------------
class config:
    max_vocab_dict_len = 50
    embedding_dim = 32
    text_cnn_num_filters = 8
    text_cnn_kernel_sizes = (2, 3, 4)
    text_cnn_dropout = 0.5           # inference/eval mode -> identity
    num_classes = 4
    seq_len = 16
    batch = 2


_LANE = 128  # lane width used for every padded operand / the output store


# ----------------------------- fused Pallas kernel -----------------------------
def make_fused_forward(B, L, V, F, ks, C):
    BL = B * L
    nb = len(ks)
    max_k = max(ks)
    group = _LANE // max_k            # lane stride between tap groups (32 here)
    # Layout invariants for the roll-based tap sum:
    assert group >= nb * F and (max_k - 1) * group + nb * F <= _LANE

    def kernel(tok_ref, wconv_ref, bconv_ref, wfc_ref, bfc_ref, o_ref):
        # (1) Embedding gather + every conv tap in ONE MXU matmul: the embedding table
        #     was pre-folded into the conv weights at prep time, so
        #     onehot(BL, V) @ wconv_eff(V, 128) directly yields every (tap, filter)
        #     pre-activation for every (batch, time) row.
        # TODO(synk): at realistic vocab sizes replace the one-hot matmul with a
        # scalar-prefetched row gather (PrefetchScalarGridSpec / manual DMA); the
        # (BL, V) one-hot is only sensible for this toy V=50.
        tok = tok_ref[...]                                              # (BL, 1) int32
        iota = jax.lax.broadcasted_iota(jnp.int32, (BL, V), 1)
        onehot = (iota == tok).astype(jnp.float32)                      # (BL, V)
        scores = jnp.dot(onehot, wconv_ref[...],
                         preferred_element_type=jnp.float32)            # (BL, 128)

        # (2) Tap-sum via XLU rolls.  Tap dk of branch b was packed at lane
        #     dk*group + b*F; rolling the whole slab by -dk rows (time) and
        #     -dk*group lanes drops that tap onto branch b's final lane slot
        #     [b*F, (b+1)*F) at time t, so the sum is (max_k-1) full-vreg adds.
        #     Rolling time on the flat (BL, 128) slab crosses batch boundaries only
        #     for rows with t >= L_out, which the validity mask below discards.
        acc = scores
        for dk in range(1, max_k):
            shifted = pltpu.roll(scores, shift=BL - dk, axis=0)               # time << dk
            shifted = pltpu.roll(shifted, shift=_LANE - dk * group, axis=1)   # lane << dk*group
            acc = acc + shifted
        acc = acc.reshape(B, L, _LANE)

        # (3) Mask invalid time steps (per branch) and all non-feature lanes with a
        #     large negative, then one full-width max over time.
        t_idx = jax.lax.broadcasted_iota(jnp.int32, (L, _LANE), 0)
        l_idx = jax.lax.broadcasted_iota(jnp.int32, (L, _LANE), 1)
        valid = None
        for b, k in enumerate(ks):
            term = (l_idx >= b * F) & (l_idx < (b + 1) * F) & (t_idx < (L - k + 1))
            valid = term if valid is None else (valid | term)
        acc = acc + jnp.where(valid, 0.0, -1e30)[None]
        pooled = jnp.max(acc, axis=1)                                   # (B, 128)

        # (4) Bias + ReLU AFTER the max (bias constant over t, ReLU monotone), all
        #     lane-dense; masked lanes become exactly 0.
        # TODO(synk): nn.Dropout is identity in eval mode; no dropout mask applied.
        feats = jnp.maximum(pooled + bconv_ref[...], 0.0)               # (B, 128)

        # (5) Classifier with lane-padded weight/bias -> lane-dense output store.
        o_ref[...] = jnp.dot(feats, wfc_ref[...],
                             preferred_element_type=jnp.float32) + bfc_ref[...]

    vmem = pl.BlockSpec(memory_space=pltpu.MemorySpace.VMEM)
    return pl.pallas_call(
        kernel,
        out_shape=jax.ShapeDtypeStruct((B, _LANE), jnp.float32),
        in_specs=[vmem] * 5,
        out_specs=vmem,
    )


# ----------------------------- one-time parameter packing -----------------------------
def prepare_params(params):
    """One-time packing of static parameters into the kernel's lane-padded layout.

    Runs once, OUTSIDE the jitted forward, so the per-call graph is just
    reshape + pallas_call (+ an output slice)."""
    ks = config.text_cnn_kernel_sizes
    F = config.text_cnn_num_filters
    C = config.num_classes
    V, E = params["embedding"].shape
    nb, max_k = len(ks), max(ks)
    group = _LANE // max_k
    assert group >= nb * F and (max_k - 1) * group + nb * F <= _LANE

    # Tap dk of branch b -> lanes [dk*group + b*F, dk*group + (b+1)*F).
    wconv = jnp.zeros((E, _LANE), jnp.float32)
    for b, k in enumerate(ks):
        w = params["conv_w"][b]                       # (F, 1, k, E)
        for dk in range(k):
            col = dk * group + b * F
            wconv = wconv.at[:, col:col + F].set(w[:, 0, dk, :].T)

    # Pre-fold the embedding table into the conv weights (exact f32 fold, one-time).
    wconv_eff = jnp.dot(params["embedding"], wconv,
                        precision=jax.lax.Precision.HIGHEST)            # (V, 128)

    # Conv bias at the final (group-0) lane positions, zero elsewhere.
    bconv = jnp.zeros((1, _LANE), jnp.float32)
    for b in range(nb):
        bconv = bconv.at[0, b * F:(b + 1) * F].set(params["conv_b"][b])

    # FC weight pre-transposed and zero-padded to (128, 128); bias padded to (1, 128).
    wfc = jnp.zeros((_LANE, _LANE), jnp.float32)
    wfc = wfc.at[:nb * F, :C].set(params["fc_w"].T)
    bfc = jnp.zeros((1, _LANE), jnp.float32)
    bfc = bfc.at[0, :C].set(params["fc_b"])

    return {"wconv_eff": wconv_eff, "bconv": bconv, "wfc": wfc, "bfc": bfc}


# ----------------------------- model forward (thin jitted wrapper) -----------------------------
@jax.jit
def textcnn_forward(tokens, packed):
    B, L = tokens.shape
    tok2d = tokens.reshape(B * L, 1).astype(jnp.int32)
    fwd = make_fused_forward(B, L, config.max_vocab_dict_len,
                             config.text_cnn_num_filters,
                             config.text_cnn_kernel_sizes, config.num_classes)
    out = fwd(tok2d, packed["wconv_eff"], packed["bconv"],
              packed["wfc"], packed["bfc"])
    return out[:, :config.num_classes]


# ----------------------------- pure-JAX reference -----------------------------
def _unfold_seq(x_emb, k):
    B, L, E = x_emb.shape
    L_out = L - k + 1
    parts = [x_emb[:, dk: dk + L_out, :] for dk in range(k)]
    return jnp.concatenate(parts, axis=-1)


def textcnn_reference(tokens, params):
    emb = jnp.take(params["embedding"], tokens, axis=0)
    feats = []
    for k, w, b in zip(config.text_cnn_kernel_sizes, params["conv_w"], params["conv_b"]):
        x_unf = _unfold_seq(emb, k)
        w_flat = w.reshape(w.shape[0], -1)
        s = jnp.einsum("ble,fe->blf", x_unf, w_flat) + b[None, None, :]
        s = jnp.maximum(s, 0.0)                  # ReLU before pool, exactly like PyTorch
        feats.append(jnp.max(s, axis=1))
    out = jnp.concatenate(feats, axis=1)
    return out @ params["fc_w"].T + params["fc_b"][None, :]


# ----------------------------- parameter init -----------------------------
def init_params(key):
    ks = iter(jax.random.split(key, 16))
    emb = 0.1 * jax.random.normal(
        next(ks), (config.max_vocab_dict_len, config.embedding_dim), jnp.float32)
    emb = emb.at[0].set(0.0)                                     # padding_idx=0
    conv_w, conv_b = [], []
    for k in config.text_cnn_kernel_sizes:
        conv_w.append(0.1 * jax.random.normal(
            next(ks), (config.text_cnn_num_filters, 1, k, config.embedding_dim), jnp.float32))
        conv_b.append(0.05 * jax.random.normal(
            next(ks), (config.text_cnn_num_filters,), jnp.float32))
    c_in = len(config.text_cnn_kernel_sizes) * config.text_cnn_num_filters
    fc_w = 0.1 * jax.random.normal(next(ks), (config.num_classes, c_in), jnp.float32)
    fc_b = 0.05 * jax.random.normal(next(ks), (config.num_classes,), jnp.float32)
    return {"embedding": emb, "conv_w": conv_w, "conv_b": conv_b, "fc_w": fc_w, "fc_b": fc_b}


if __name__ == "__main__":
    key = jax.random.PRNGKey(0)
    pkey, tkey = jax.random.split(key)
    params = init_params(pkey)
    tokens = jax.random.randint(
        tkey, (config.batch, config.seq_len), 1, config.max_vocab_dict_len, jnp.int32)

    packed = prepare_params(params)          # one-time packing, outside the jitted forward

    out = jax.block_until_ready(textcnn_forward(tokens, packed))
    ref = jax.block_until_ready(textcnn_reference(tokens, params))

    assert out.shape == (config.batch, config.num_classes), out.shape
    assert jnp.allclose(out, ref, atol=2e-4, rtol=2e-4), (out, ref)
    print("KERNEL_OK")
</pallas_src>

<mosaic_0001>
module attributes {stable_mosaic.version = 11 : i64} {
  func.func @kernel(%arg0: memref<32x1xi32, #tpu.memory_space<vmem>>, %arg1: memref<50x128xf32, #tpu.memory_space<vmem>>, %arg2: memref<1x128xf32, #tpu.memory_space<vmem>>, %arg3: memref<128x128xf32, #tpu.memory_space<vmem>>, %arg4: memref<1x128xf32, #tpu.memory_space<vmem>>, %arg5: memref<2x128xf32, #tpu.memory_space<vmem>>) attributes {dimension_semantics = [], scalar_prefetch = 0 : i64, scratch_operands = 0 : i64, tpu.core_type = #tpu.core_type<tc>} {
    %c0 = arith.constant 0 : index
    %c0_0 = arith.constant 0 : index
    %0 = vector.load %arg0[%c0, %c0_0] : memref<32x1xi32, #tpu.memory_space<vmem>>, vector<32x1xi32>
    %1 = tpu.iota {dimensions = array<i32: 1>} : vector<32x50xi32>
    %2 = vector.broadcast %0 : vector<32x1xi32> to vector<32x50xi32>
    %3 = arith.cmpi eq, %1, %2 : vector<32x50xi32>
    %4 = arith.extui %3 : vector<32x50xi1> to vector<32x50xi32>
    %5 = arith.sitofp %4 : vector<32x50xi32> to vector<32x50xf32>
    %c0_1 = arith.constant 0 : index
    %c0_2 = arith.constant 0 : index
    %6 = vector.load %arg1[%c0_1, %c0_2] : memref<50x128xf32, #tpu.memory_space<vmem>>, vector<50x128xf32>
    %cst = arith.constant dense<0.000000e+00> : vector<32x128xf32>
    %7 = tpu.matmul %5, %6, %cst {dimension_numbers = #tpu.dot_dimension_numbers<[1], [0], [0], [1], [0, 0, 1, 1], [], []>} : vector<32x50xf32>, vector<50x128xf32>, vector<32x128xf32> -> vector<32x128xf32>
    %c31_i32 = arith.constant 31 : i32
    %8 = tpu.dynamic_rotate %7 by %c31_i32 dim 0 : vector<32x128xf32>, i32 -> vector<32x128xf32>
    %c96_i32 = arith.constant 96 : i32
    %9 = tpu.dynamic_rotate %8 by %c96_i32 dim 1 : vector<32x128xf32>, i32 -> vector<32x128xf32>
    %10 = arith.addf %7, %9 : vector<32x128xf32>
    %c30_i32 = arith.constant 30 : i32
    %11 = tpu.dynamic_rotate %7 by %c30_i32 dim 0 : vector<32x128xf32>, i32 -> vector<32x128xf32>
    %c64_i32 = arith.constant 64 : i32
    %12 = tpu.dynamic_rotate %11 by %c64_i32 dim 1 : vector<32x128xf32>, i32 -> vector<32x128xf32>
    %13 = arith.addf %10, %12 : vector<32x128xf32>
    %c29_i32 = arith.constant 29 : i32
    %14 = tpu.dynamic_rotate %7 by %c29_i32 dim 0 : vector<32x128xf32>, i32 -> vector<32x128xf32>
    %c32_i32 = arith.constant 32 : i32
    %15 = tpu.dynamic_rotate %14 by %c32_i32 dim 1 : vector<32x128xf32>, i32 -> vector<32x128xf32>
    %16 = arith.addf %13, %15 : vector<32x128xf32>
    %17 = vector.shape_cast %16 : vector<32x128xf32> to vector<2x16x128xf32>
    %18 = tpu.iota {dimensions = array<i32: 0>} : vector<16x128xi32>
    %19 = tpu.iota {dimensions = array<i32: 1>} : vector<16x128xi32>
    %c0_i32 = arith.constant 0 : i32
    %20 = vector.broadcast %c0_i32 : i32 to vector<16x128xi32>
    %21 = arith.cmpi sge, %19, %20 : vector<16x128xi32>
    %c8_i32 = arith.constant 8 : i32
    %22 = vector.broadcast %c8_i32 : i32 to vector<16x128xi32>
    %23 = arith.cmpi slt, %19, %22 : vector<16x128xi32>
    %24 = arith.andi %21, %23 : vector<16x128xi1>
    %c15_i32 = arith.constant 15 : i32
    %25 = vector.broadcast %c15_i32 : i32 to vector<16x128xi32>
    %26 = arith.cmpi slt, %18, %25 : vector<16x128xi32>
    %27 = arith.andi %24, %26 : vector<16x128xi1>
    %c8_i32_3 = arith.constant 8 : i32
    %28 = vector.broadcast %c8_i32_3 : i32 to vector<16x128xi32>
    %29 = arith.cmpi sge, %19, %28 : vector<16x128xi32>
    %c16_i32 = arith.constant 16 : i32
    %30 = vector.broadcast %c16_i32 : i32 to vector<16x128xi32>
    %31 = arith.cmpi slt, %19, %30 : vector<16x128xi32>
    %32 = arith.andi %29, %31 : vector<16x128xi1>
    %c14_i32 = arith.constant 14 : i32
    %33 = vector.broadcast %c14_i32 : i32 to vector<16x128xi32>
    %34 = arith.cmpi slt, %18, %33 : vector<16x128xi32>
    %35 = arith.andi %32, %34 : vector<16x128xi1>
    %36 = arith.ori %27, %35 : vector<16x128xi1>
    %c16_i32_4 = arith.constant 16 : i32
    %37 = vector.broadcast %c16_i32_4 : i32 to vector<16x128xi32>
    %38 = arith.cmpi sge, %19, %37 : vector<16x128xi32>
    %c24_i32 = arith.constant 24 : i32
    %39 = vector.broadcast %c24_i32 : i32 to vector<16x128xi32>
    %40 = arith.cmpi slt, %19, %39 : vector<16x128xi32>
    %41 = arith.andi %38, %40 : vector<16x128xi1>
    %c13_i32 = arith.constant 13 : i32
    %42 = vector.broadcast %c13_i32 : i32 to vector<16x128xi32>
    %43 = arith.cmpi slt, %18, %42 : vector<16x128xi32>
    %44 = arith.andi %41, %43 : vector<16x128xi1>
    %45 = arith.ori %36, %44 : vector<16x128xi1>
    %cst_5 = arith.constant 0.000000e+00 : f32
    %cst_6 = arith.constant -1.000000e+30 : f32
    %46 = vector.broadcast %cst_5 : f32 to vector<16x128xf32>
    %47 = vector.broadcast %cst_6 : f32 to vector<16x128xf32>
    %48 = arith.select %45, %46, %47 : vector<16x128xi1>, vector<16x128xf32>
    %49 = vector.shape_cast %48 : vector<16x128xf32> to vector<1x16x128xf32>
    %50 = vector.broadcast %49 : vector<1x16x128xf32> to vector<2x16x128xf32>
    %51 = arith.addf %17, %50 : vector<2x16x128xf32>
    %cst_7 = arith.constant dense<0xFF800000> : vector<2x128xf32>
    %52 = vector.multi_reduction <maximumf>, %51, %cst_7 [1] : vector<2x16x128xf32> to vector<2x128xf32>
    %c0_8 = arith.constant 0 : index
    %c0_9 = arith.constant 0 : index
    %53 = vector.load %arg2[%c0_8, %c0_9] : memref<1x128xf32, #tpu.memory_space<vmem>>, vector<1x128xf32>
    %54 = vector.broadcast %53 : vector<1x128xf32> to vector<2x128xf32>
    %55 = arith.addf %52, %54 : vector<2x128xf32>
    %cst_10 = arith.constant 0.000000e+00 : f32
    %56 = vector.broadcast %cst_10 : f32 to vector<2x128xf32>
    %57 = arith.maximumf %55, %56 : vector<2x128xf32>
    %c0_11 = arith.constant 0 : index
    %c0_12 = arith.constant 0 : index
    %58 = vector.load %arg3[%c0_11, %c0_12] : memref<128x128xf32, #tpu.memory_space<vmem>>, vector<128x128xf32>
    %cst_13 = arith.constant dense<0.000000e+00> : vector<2x128xf32>
    %59 = tpu.matmul %57, %58, %cst_13 {dimension_numbers = #tpu.dot_dimension_numbers<[1], [0], [0], [1], [0, 0, 1, 1], [], []>} : vector<2x128xf32>, vector<128x128xf32>, vector<2x128xf32> -> vector<2x128xf32>
    %c0_14 = arith.constant 0 : index
    %c0_15 = arith.constant 0 : index
    %60 = vector.load %arg4[%c0_14, %c0_15] : memref<1x128xf32, #tpu.memory_space<vmem>>, vector<1x128xf32>
    %61 = vector.broadcast %60 : vector<1x128xf32> to vector<2x128xf32>
    %62 = arith.addf %59, %61 : vector<2x128xf32>
    %c0_16 = arith.constant 0 : index
    %c0_17 = arith.constant 0 : index
    %63 = vector.load %arg5[%c0_16, %c0_17] : memref<2x128xf32, #tpu.memory_space<vmem>>, vector<2x128xf32>
    tpu.vector_store %arg5[%c0_16, %c0_17], %62 {strides = array<i32>} : memref<2x128xf32, #tpu.memory_space<vmem>>, vector<2x128xf32>,
    return
  }
}

</mosaic_0001>

<bundles_post_ra>
// kernel: textcnn_forward.1
= control target key start
LH: loop header
LB: loop body
LE: loop exit
PB: predicated region body
PF: predicated region fallthrough
CT: control target
= control target key end

     0   :  { %10 = vsyncpa [#allocation3], 0  ;;  %s830_s0 = inlined_call_operand.vmem [shape: s32[32,1], index: 0, kind: input, shape index: {}]   ;;  %s831_s1 = inlined_call_operand.hbm [shape: f32[50,128], index: 1, kind: input, shape index: {}]   ;;  %s832_s2 = inlined_call_operand.vmem [shape: f32[1,128], index: 2, kind: input, shape index: {}]   ;;  %s833_s3 = inlined_call_operand.hbm [shape: f32[128,128], index: 3, kind: input, shape index: {}]   ;;  %s834_s4 = inlined_call_operand.vmem [shape: f32[1,128], index: 4, kind: input, shape index: {}]   ;;  %s835_s5 = inlined_call_operand.hbm [shape: f32[2,128], index: 5, kind: output, shape index: {}]  }
   0x1   :  { %11 = vsyncpa [#allocation6], 0 }
   0x2   :  { %12 = vsyncpa [#allocation4], 0  ;;  %s643_s18 = smov [#allocation2]   ;;  %s571_s22 = scalar_lea.hbm %s831_s1, 896 }
   0x3   :  { %s20_s19 = sshll.u32 %s643_s18, 4  ;;  %p572_p0 = scmp.ne.s32.totalorder %s831_s1, %s571_s22  ;;  %s21_s19 = int_to_ptr.vmem [resolvable:$true] %s20_s19 }
   0x4   :  { %p575_p1 = scmp.lt.u32.totalorder %s571_s22, %s831_s1 }
   0x6   :  { %p577_p2 = pnand %p575_p1, %p572_p0 }
   0x8   :  { %580 = shalt.err (!%p577_p2)
}
   0x9   :  { %s581_s27 = scalar_lea.vmem %s21_s19, 896  ;;  %p586_p4 = scmp.lt.s32.totalorder %s21_s19, %s21_s19 }
   0xa   :  { %p582_p3 = scmp.ne.s32.totalorder %s21_s19, %s581_s27  ;;  %p587_p5 = scmp.lt.s32.totalorder %s581_s27, %s581_s27 }
   0xc   :  { %p588_p6 = por %p587_p5, %p586_p4 }
   0xe   :  { %p589_p7 = pnand %p588_p6, %p582_p3 }
  0x10   :  { %592 = shalt.err (!%p589_p7)
}
  0x11   :  { %s644_s28 = smov 128   ;;  %s645_s29 = smov 8  }
  0x12   :  { %26 = dma.hbm_to_vmem [thread:$0]  %s831_s1, 896, %s21_s19, [#allocation3], %s644_s28, %s644_s28, %s645_s29  }
  0x13   :  { %s646_s7 = smov [#allocation5]   ;;  %s593_s11 = scalar_lea.hbm %s833_s3, 2048 }
  0x14   :  { %s34_s8 = sshll.u32 %s646_s7, 4  ;;  %p594_p8 = scmp.ne.s32.totalorder %s833_s3, %s593_s11  ;;  %s35_s8 = int_to_ptr.vmem [resolvable:$true] %s34_s8 }
  0x15   :  { %p597_p9 = scmp.lt.u32.totalorder %s593_s11, %s833_s3 }
  0x17   :  { %p599_p10 = pnand %p597_p9, %p594_p8 }
  0x19   :  { %602 = shalt.err (!%p599_p10)
}
  0x1a   :  { %s603_s16 = scalar_lea.vmem %s35_s8, 2048  ;;  %p608_p12 = scmp.lt.s32.totalorder %s35_s8, %s35_s8 }
  0x1b   :  { %p604_p11 = scmp.ne.s32.totalorder %s35_s8, %s603_s16  ;;  %p609_p13 = scmp.lt.s32.totalorder %s603_s16, %s603_s16 }
  0x1d   :  { %p610_p0 = por %p609_p13, %p608_p12 }
  0x1f   :  { %p611_p1 = pnand %p610_p0, %p604_p11 }
  0x21   :  { %614 = shalt.err (!%p611_p1)
}
  0x22   :  { %40 = dma.hbm_to_vmem [thread:$0]  %s833_s3, 2048, %s35_s8, [#allocation6], %s644_s28, %s644_s28, %s645_s29  }
  0x23   :  { %637 = dma.done.wait [#allocation3], 896  }
  0x24   :  { %638 = vsyncadd [#allocation3], 4294966400 }
  0x25   :  { %639 = dma.done.wait [#allocation6], 2048  }
  0x26   :  { %640 = vsyncadd [#allocation6], 4294965248  ;;  %v647_v0 = vmov 0   ;;  %v51_v1 = vld [vmem:[%s830_s0 + $0x10] sm:$0xff]  ;;  %v49_v2 = vld [vmem:[%s830_s0] sm:$0xff]  ;;  %vm99_vm0 = vcmask 1041408   ;;  %v53_v15 = vlaneseq }
  0x27   :  { %570 = vset.pattern.permute.xlu1 %v647_v0  ;;  %569 = vset.pattern.permute.xlu0 %v647_v0  ;;  %v52_v3 = vld [vmem:[%s830_s0 + $0x18] sm:$0xff]  ;;  %v79_v4 = vld [vmem:[#allocation2] sm:$0xff]  ;;  %v80_v5 = vld [vmem:[#allocation2 + $0x8] sm:$0xff]  ;;  %vm86_vm1 = vcmask 408576   ;;  %v648_v19 = vmov 0.0   ;;  %v650_v47 = vmov 0.0|0.0  }
  0x28   :  { %62 = vperm.xlu1 %570, %v51_v1   ;;  %56 = vperm.xlu0 %569, %v49_v2   ;;  %v50_v6 = vld [vmem:[%s830_s0 + $0x8] sm:$0xff]  ;;  %v520_v7 = vpack.c.bf16 %v80_v5, %v79_v4  ;;  %v81_v8 = vld [vmem:[#allocation2 + $0x10] sm:$0xff]  ;;  %v82_v9 = vld [vmem:[#allocation2 + $0x18] sm:$0xff]  ;;  %v722_v16 = vand.u32 127, %v53_v15  ;;  %v732_v26 = vshrl.u32 %v53_v15, 7  ;;  %s649_s0 = smov 96  }
  0x29   :  { %v524_v10 = vpack.c.bf16 %v82_v9, %v81_v8  ;;  %v83_v11 = vld [vmem:[#allocation2 + $0x20] sm:$0xff]  ;;  %v84_v12 = vld [vmem:[#allocation2 + $0x28] sm:$0xff]  ;;  %v85_v14 = vld [vmem:[#allocation2 + $0x30] sm:$0x3]  ;;  %532 = vmatprep.subr.bf16.mxu1 %v650_v47  ;;  %s651_s25 = smov 64   ;;  %s652_s26 = smov 32  }
  0x2a   :  { %521 = vmatprep.subr.bf16.mxu0 %v520_v7  ;;  %v528_v13 = vpack.c.bf16 %v84_v12, %v83_v11  ;;  %vm194_vm6 = vcmp.lt.s32.totalorder %v732_v26, 7  ;;  %vm215_vm7 = vcmp.lt.s32.totalorder %v732_v26, 6  ;;  %vm236_vm8 = vcmp.lt.s32.totalorder %v732_v26, 5  ;;  %v310_v43 = vld [vmem:[#allocation5] sm:$0xff]  ;;  %v311_v48 = vld [vmem:[#allocation5 + $0x8] sm:$0xff]  ;;  %v312_v59 = vld [vmem:[#allocation5 + $0x10] sm:$0xff] }
  0x2b   :  { %523 = vmatpush3.bf16.msra.mxu0 %v520_v7  ;;  %v533_v52 = vpack.c.bf16 %v311_v48, %v310_v43  ;;  %v313_v60 = vld [vmem:[#allocation5 + $0x18] sm:$0xff]  ;;  %v314_v62 = vld [vmem:[#allocation5 + $0x20] sm:$0xff]  ;;  %v315_v63 = vld [vmem:[#allocation5 + $0x28] sm:$0xff]  ;;  %vm653_vm9 = vmmov 0   ;;  %vm261_vm10 = vcmp.ge.s32.totalorder %v722_v16, 8  ;;  %vm262_vm11 = vcmp.lt.s32.totalorder %v722_v16, 16 }
  0x2c   :  { %65 = vperm.xlu1 %570, %v52_v3   ;;  %59 = vperm.xlu0 %569, %v50_v6   ;;  %v536_v61 = vpack.c.bf16 %v313_v60, %v312_v59  ;;  %v539_v0 = vpack.c.bf16 %v315_v63, %v314_v62  ;;  %v316_v1 = vld [vmem:[#allocation5 + $0x30] sm:$0xff]  ;;  %v317_v2 = vld [vmem:[#allocation5 + $0x38] sm:$0xff]  ;;  %v318_v4 = vld [vmem:[#allocation5 + $0x40] sm:$0xff]  ;;  %vm255_vm12 = vcmp.lt.s32.totalorder %v722_v16, 8  ;;  %s655_s6 = smov [#allocation7]  }
  0x2d   :  { %525 = vmatprep.subr.bf16.mxu0 %v524_v10  ;;  %534 = vmatpush3.bf16.msra.mxu1 %v533_v52  ;;  %v542_v3 = vpack.c.bf16 %v317_v2, %v316_v1  ;;  %v319_v5 = vld [vmem:[#allocation5 + $0x48] sm:$0xff]  ;;  %v320_v7 = vld [vmem:[#allocation5 + $0x50] sm:$0xff]  ;;  %v321_v8 = vld [vmem:[#allocation5 + $0x58] sm:$0xff]  ;;  %s416_s7 = sshll.u32 %s655_s6, 4  ;;  %s417_s7 = int_to_ptr.vmem [resolvable:$true] %s416_s7 }
  0x2e   :  { %535 = vmatprep.subr.bf16.mxu1 %v650_v47  ;;  %v545_v6 = vpack.c.bf16 %v319_v5, %v318_v4  ;;  %v548_v9 = vpack.c.bf16 %v321_v8, %v320_v7  ;;  %v323_v11 = vld [vmem:[#allocation5 + $0x68] sm:$0xff]  ;;  %517 = vmatprep.mubr.msk.f32.mxu1 %vm653_vm9, %v648_v19  ;;  %vm263_vm14 = vmand %vm261_vm10, %vm262_vm11  ;;  %vm336_vm11 = vcmask 1041409   ;;  %p620_p3 = scmp.lt.s32.totalorder %s417_s7, %s417_s7 }
  0x2f   :  { %527 = vmatpush3.bf16.msra.mxu0 %v524_v10  ;;  %v322_v10 = vld [vmem:[#allocation5 + $0x60] sm:$0xff] }
  0x30   :  { %529 = vmatprep.subr.bf16.mxu0 %v528_v13  ;;  %v551_v12 = vpack.c.bf16 %v323_v11, %v322_v10 }
  0x31   :  { %537 = vmatpush3.bf16.msra.mxu1 %v536_v61 }
  0x32   :  { %538 = vmatprep.subr.bf16.mxu1 %v650_v47 }
  0x33   :  { %531 = vmatpush3.bf16.msra.mxu0 %v528_v13  ;;  %v324_v13 = vld [vmem:[#allocation5 + $0x70] sm:$0xff] }
  0x34   :  { %477 = vmatprep.subr.msk.mxu0 %vm99_vm0, %v85_v14 }
  0x35   :  { %540 = vmatpush3.bf16.msra.mxu1 %v539_v0 }
  0x36   :  { %541 = vmatprep.subr.bf16.mxu1 %v650_v47 }
  0x37   :  { %478 = vmatpush3.msk.msra.mxu0 %vm99_vm0, %v85_v14  ;;  %v325_v14 = vld [vmem:[#allocation5 + $0x78] sm:$0xff]  ;;  %vm270_vm0 = vcmp.ge.s32.totalorder %v722_v16, 16 }
  0x38   :  { %v554_v15 = vpack.c.bf16 %v325_v14, %v324_v13 }
  0x39   :  { %543 = vmatpush3.bf16.msra.mxu1 %v542_v3 }
  0x3a   :  { %544 = vmatprep.subr.bf16.mxu1 %v650_v47 }
  0x3d   :  { %546 = vmatpush3.bf16.msra.mxu1 %v545_v6  ;;  %v436_v6 = vld [vmem:[%s834_s4] ss:$0 sm:$0xff] }
  0x3e   :  { %547 = vmatprep.subr.bf16.mxu1 %v650_v47 }
  0x41   :  { %549 = vmatpush3.bf16.msra.mxu1 %v548_v9 }
  0x42   :  { %550 = vmatprep.subr.bf16.mxu1 %v650_v47 }
  0x45   :  { %552 = vmatpush3.bf16.msra.mxu1 %v551_v12 }
  0x46   :  { %553 = vmatprep.subr.bf16.mxu1 %v650_v47 }
  0x49   :  { %555 = vmatpush3.bf16.msra.mxu1 %v554_v15 }
  0xa7   :  { %v63_v17 = vpop.permute.xlu1 %62  ;;  %v57_v18 = vpop.permute.xlu0 %56 }
  0xa8   :  { %vm67_vm2 = vcmp.eq.s32.totalorder %v722_v16, %v57_v18  ;;  %vm69_vm3 = vcmp.eq.s32.totalorder %v722_v16, %v63_v17  ;;  %v253_v17 = vadd.s32 8, %v732_v26 }
  0xa9   :  { %v426_v20 = vsel %vm67_vm2, 1.0, %v648_v19  ;;  %v428_v23 = vsel %vm69_vm3, 1.0, %v648_v19 }
  0xaa   :  { %479 = vmatprep.mubr.msk.f32.mxu0 %vm86_vm1, %v426_v20  ;;  %vm258_vm13 = vcmp.lt.s32.totalorder %v253_v17, 15  ;;  %vm265_vm15 = vcmp.lt.s32.totalorder %v253_v17, 14 }
  0xab   :  { %v66_v21 = vpop.permute.xlu1 %65  ;;  %v60_v22 = vpop.permute.xlu0 %59  ;;  %vm260_vm2 = vmand %vm255_vm12, %vm258_vm13 }
  0xac   :  { %vm68_vm4 = vcmp.eq.s32.totalorder %v722_v16, %v60_v22  ;;  %vm70_vm5 = vcmp.eq.s32.totalorder %v722_v16, %v66_v21  ;;  %vm267_vm3 = vmand %vm263_vm14, %vm265_vm15 }
  0xad   :  { %v427_v24 = vsel %vm68_vm4, 1.0, %v648_v19  ;;  %v429_v25 = vsel %vm70_vm5, 1.0, %v648_v19  ;;  %vm274_vm5 = vcmp.lt.s32.totalorder %v253_v17, 13 }
  0xae   :  { %480 = vmatmul.mubr.msk.f32.vlgmr.msra.gmra.mrb[0].mxu0 %vm86_vm1, %v427_v24 }
  0xaf   :  { %482 = vmatprep.mubr.msk.f32.mxu0 %vm86_vm1, %v428_v23 }
  0xb2   :  { %483 = vmatmul.mubr.msk.f32.gmra.mrb[2].mxu0 %vm86_vm1, %v429_v25  ;;  %vm271_vm1 = vcmp.lt.s32.totalorder %v722_v16, 24 }
  0xb3   :  { %vm798_vm4 = vmand %vm270_vm0, %vm271_vm1 }
 0x181   :  { %v734_v27 = vpop.f32.mrb[0].mxu0 }
 0x182   :  { %v189_v28 = vrot.slane %v734_v27, 1  ;;  %v212_v29 = vrot.slane %v734_v27, 2  ;;  %v233_v30 = vrot.slane %v734_v27, 3  ;;  %v741_v31 = vpop.f32.mrb[1].mxu0 }
 0x183   :  { %v188_v32 = vrot.slane %v741_v31, 1  ;;  %v211_v33 = vrot.slane %v741_v31, 2  ;;  %v232_v34 = vrot.slane %v741_v31, 3 }
 0x185   :  { %v747_v35 = vpop.f32.mrb[2].mxu0  ;;  %v197_v36 = vsel %vm194_vm6, %v188_v32, %v189_v28  ;;  %v218_v37 = vsel %vm215_vm7, %v211_v33, %v212_v29  ;;  %v239_v38 = vsel %vm236_vm8, %v232_v34, %v233_v30 }
 0x186   :  { %v191_v39 = vrot.slane %v747_v35, 1  ;;  %v214_v40 = vrot.slane %v747_v35, 2  ;;  %v235_v41 = vrot.slane %v747_v35, 3  ;;  %199 = vrot.lane.b32.xlu0 %v197_v36, %s649_s0  ;;  %v759_v42 = vpop.f32.mrb[3].mxu0 }
 0x187   :  { %v190_v44 = vrot.slane %v759_v42, 1  ;;  %v213_v45 = vrot.slane %v759_v42, 2  ;;  %v234_v46 = vrot.slane %v759_v42, 3 }
 0x188   :  { %v198_v49 = vsel %vm194_vm6, %v191_v39, %v188_v32  ;;  %v219_v50 = vsel %vm215_vm7, %v214_v40, %v211_v33  ;;  %v240_v51 = vsel %vm236_vm8, %v235_v41, %v232_v34  ;;  %v654_v34 = vmov -1e+30  }
 0x189   :  { %205 = vrot.lane.b32.xlu1 %v198_v49, %s649_s0  ;;  %v195_v53 = vsel %vm194_vm6, %v190_v44, %v191_v39  ;;  %v216_v54 = vsel %vm215_vm7, %v213_v45, %v214_v40  ;;  %v196_v55 = vsel %vm194_vm6, %v189_v28, %v190_v44  ;;  %v237_v56 = vsel %vm236_vm8, %v234_v46, %v235_v41  ;;  %vm269_vm6 = vmor %vm260_vm2, %vm267_vm3 }
 0x18a   :  { %220 = vrot.lane.b32.xlu0 %v218_v37, %s651_s25  ;;  %v217_v57 = vsel %vm215_vm7, %v212_v29, %v213_v45  ;;  %v238_v58 = vsel %vm236_vm8, %v233_v30, %v234_v46  ;;  %vm276_vm7 = vmand %vm798_vm4, %vm274_vm5 }
 0x18b   :  { %vm268_vm8 = vmor %vm255_vm12, %vm263_vm14 }
 0x18c   :  { %vm278_vm9 = vmor %vm269_vm6, %vm276_vm7 }
 0x18d   :  { %226 = vrot.lane.b32.xlu1 %v219_v50, %s651_s25  ;;  %vm277_vm10 = vmor %vm268_vm8, %vm798_vm4  ;;  %v280_v36 = vsel %vm278_vm9, 0.0, %v654_v34 }
 0x18e   :  { %203 = vrot.lane.b32.xlu0 %v195_v53, %s649_s0  ;;  %v279_v37 = vsel %vm277_vm10, 0.0, %v654_v34 }
 0x191   :  { %247 = vrot.lane.b32.xlu1 %v240_v51, %s652_s26 }
 0x192   :  { %224 = vrot.lane.b32.xlu0 %v216_v54, %s651_s25 }
 0x195   :  { %201 = vrot.lane.b32.xlu1 %v196_v55, %s649_s0 }
 0x196   :  { %245 = vrot.lane.b32.xlu0 %v237_v56, %s652_s26 }
 0x199   :  { %222 = vrot.lane.b32.xlu1 %v217_v57, %s651_s25 }
 0x19a   :  { %241 = vrot.lane.b32.xlu0 %v239_v38, %s652_s26 }
 0x19d   :  { %243 = vrot.lane.b32.xlu1 %v238_v58, %s652_s26 }
 0x1f8   :  { %v200_v18 = vpop.permute.xlu0 %199 }
 0x1f9   :  { %v207_v39 = vadd.f32 %v200_v18, %v741_v31 }
 0x1fb   :  { %v206_v20 = vpop.permute.xlu1 %205 }
 0x1fc   :  { %v221_v19 = vpop.permute.xlu0 %220  ;;  %v210_v24 = vadd.f32 %v747_v35, %v206_v20 }
 0x1fd   :  { %v228_v43 = vadd.f32 %v221_v19, %v207_v39 }
 0x1ff   :  { %v227_v22 = vpop.permute.xlu1 %226 }
 0x200   :  { %v204_v23 = vpop.permute.xlu0 %203  ;;  %v231_v28 = vadd.f32 %v227_v22, %v210_v24 }
 0x201   :  { %v209_v29 = vadd.f32 %v204_v23, %v759_v42 }
 0x203   :  { %v248_v25 = vpop.permute.xlu1 %247 }
 0x204   :  { %v225_v26 = vpop.permute.xlu0 %224  ;;  %v252_v30 = vadd.f32 %v248_v25, %v231_v28 }
 0x205   :  { %v230_v32 = vadd.f32 %v225_v26, %v209_v29 }
 0x206   :  { %v284_v35 = vadd.f32 %v280_v36, %v252_v30 }
 0x207   :  { %v202_v33 = vpop.permute.xlu1 %201 }
 0x208   :  { %v246_v38 = vpop.permute.xlu0 %245  ;;  %v208_v44 = vadd.f32 %v734_v27, %v202_v33  ;;  %v435_v27 = vld [vmem:[%s832_s2] ss:$0 sm:$0xff]  ;;  %s615_s2 = scalar_lea.vmem %s417_s7, 32 }
 0x209   :  { %v251_v16 = vadd.f32 %v246_v38, %v230_v32  ;;  %p616_p2 = scmp.ne.s32.totalorder %s417_s7, %s615_s2  ;;  %p621_p4 = scmp.lt.s32.totalorder %s615_s2, %s615_s2 }
 0x20b   :  { %v283_v40 = vadd.f32 %v279_v37, %v251_v16  ;;  %v223_v41 = vpop.permute.xlu1 %222  ;;  %p622_p5 = por %p621_p4, %p620_p3 }
 0x20c   :  { %v242_v42 = vpop.permute.xlu0 %241  ;;  %v229_v46 = vadd.f32 %v223_v41, %v208_v44 }
 0x20d   :  { %v292_v45 = vmax.f32 %v283_v40, %v284_v35  ;;  %v249_v47 = vadd.f32 %v242_v42, %v228_v43  ;;  %p623_p6 = pnand %p622_p5, %p616_p2 }
 0x20f   :  { %v293_v48 = vrot.slane %v292_v45, 4  ;;  %v244_v49 = vpop.permute.xlu1 %243  ;;  %v281_v52 = vadd.f32 %v279_v37, %v249_v47 }
 0x210   :  { %v250_v50 = vadd.f32 %v244_v49, %v229_v46 }
 0x211   :  { %v294_v51 = vmax.f32 %v292_v45, %v293_v48 }
 0x212   :  { %v282_v53 = vadd.f32 %v280_v36, %v250_v50 }
 0x213   :  { %v295_v54 = vrot.slane %v294_v51, 2 }
 0x214   :  { %v285_v55 = vmax.f32 %v281_v52, %v282_v53 }
 0x215   :  { %v296_v56 = vmax.f32 %v294_v51, %v295_v54 }
 0x216   :  { %v286_v31 = vrot.slane %v285_v55, 4 }
 0x217   :  { %v297_v57 = vrot.slane %v296_v56, 1 }
 0x218   :  { %v287_v58 = vmax.f32 %v285_v55, %v286_v31 }
 0x219   :  { %v298_v59 = vmax.f32 %v296_v56, %v297_v57 }
 0x21a   :  { %v288_v60 = vrot.slane %v287_v58, 2 }
 0x21b   :  { %v307_v62 = vadd.f32 %v435_v27, %v298_v59 }
 0x21c   :  { %v289_v61 = vmax.f32 %v287_v58, %v288_v60 }
 0x21d   :  { %v309_v1 = vmax.f32 %v307_v62, 0.0 }
 0x21e   :  { %v290_v63 = vrot.slane %v289_v61, 1 }
 0x21f   :  { %v335_v4 = vrot.slane %v309_v1, 7 }
 0x220   :  { %v291_v0 = vmax.f32 %v289_v61, %v290_v63 }
 0x222   :  { %v306_v2 = vadd.f32 %v435_v27, %v291_v0 }
 0x224   :  { %v308_v3 = vmax.f32 %v306_v2, 0.0 }
 0x226   :  { %v337_v5 = vsel %vm336_vm11, %v335_v4, %v308_v3 }
 0x227   :  { %518 = vmatmul.mubr.f32.vlgmr.msra.gmra.mrb[0].mxu1 %v337_v5 }
 0x2fa   :  { %v405_v7 = vpop.f32.mrb[0].mxu1 }
 0x2fb   :  { %v406_v8 = vadd.f32 %v436_v6, %v405_v7  ;;  %v519_v9 = vpop.f32.mrb[1].mxu1 }
 0x2fd   :  { %409 = vst [vmem:[#allocation7] sm:$0x3] %v406_v8 }
 0x2fe   :  { %626 = shalt.err (!%p623_p6)
}
 0x2ff   :  { %s627_s10 = scalar_lea.hbm %s835_s5, 32 }
 0x300   :  { %p628_p7 = scmp.ne.s32.totalorder %s835_s5, %s627_s10  ;;  %p631_p8 = scmp.lt.u32.totalorder %s627_s10, %s835_s5 }
 0x302   :  { %p633_p9 = pnand %p631_p8, %p628_p7 }
 0x304   :  { %636 = shalt.err (!%p633_p9)
}
 0x305   :  { %419 = dma.vmem_to_hbm [thread:$0]  %s417_s7, 32, %s835_s5, [#allocation4]  }
 0x306   :  { %641 = dma.done.wait [#allocation4], 32  }
 0x307   :  { %642 = vsyncadd [#allocation4], 4294967264 }
 0x308   :  { %423 = vsyncpa [#allocation3], 1 }
 0x309   :  { %424 = vsyncpa [#allocation6], 1 }
 0x30a   :  { %425 = vsyncpa [#allocation4], 1 }

</bundles_post_ra>
